<compile_context>
chip_gen: v7x
topology: tpu7x:2x2x1
jax: 0.10.0
libtpu: 0.0.40
codegen_flags: <defaults>
</compile_context>

<pallas_src>
import math

import jax
import jax.numpy as jnp
from jax.experimental import pallas as pl
from jax.experimental.pallas import tpu as pltpu


def _normalization_kernel(x_ref, mean_ref, inv_std_ref, o_ref):
    # x_ref:       (tr, W) tile of the (lane-packed) input
    # mean_ref:    (1, W)  VMEM-resident, broadcast over sublanes
    # inv_std_ref: (1, W)  precomputed reciprocal of std
    o_ref[...] = (x_ref[...] - mean_ref[...]) * inv_std_ref[...]


def normalization(x, mean, std, *, tile_budget_bytes=2 * 1024 * 1024,
                  force_kernel=False, min_kernel_elems=8192):
    """(x - mean) / std with mean/std of shape (1, n_in), Pallas-accelerated."""
    orig_shape = x.shape
    n_in = orig_shape[-1]
    x2 = x.reshape(-1, n_in)            # free reshape; supports (..., n_in)
    B = x2.shape[0]

    mean = jnp.asarray(mean, x.dtype).reshape(1, n_in)
    std_f32 = jnp.asarray(std, jnp.float32).reshape(1, n_in)
    # Precompute the reciprocal once (tiny op, amortized over the batch).
    inv_std = (1.0 / std_f32).astype(x.dtype)

    if not force_kernel and x2.size < min_kernel_elems:
        # Tiny input: launch overhead dominates; stay in XLA.
        out = ((x2 - mean) * inv_std).astype(x.dtype)
        return out.reshape(orig_shape)

    # ---- lane-dense packing: fold rows into the 128-lane axis when free ----
    # pack is a power of 2 (128 / gcd(n_in, 128)); only taken when B divides
    # it so the reshape is a zero-copy bitcast (no pad/slice HBM traffic).
    pack = 128 // math.gcd(n_in, 128)
    while pack > 1 and B % pack != 0:
        pack //= 2
    if pack > 1:
        x_work = x2.reshape(B // pack, pack * n_in)
        m_work = jnp.tile(mean, (1, pack))
        s_work = jnp.tile(inv_std, (1, pack))
    else:
        x_work, m_work, s_work = x2, mean, inv_std

    R, W = x_work.shape
    itemsize = x_work.dtype.itemsize
    # Sub-32-bit dtypes pack along sublanes: round rows to the native multiple.
    sublane = {4: 8, 2: 16, 1: 32}.get(itemsize, 8)

    # ---- row tiling: byte-budgeted tiles + guaranteed multi-step grid ----
    if R <= sublane:
        tr = R                       # tiny: single full-extent block
    else:
        rows_budget = max(
            sublane, (tile_budget_bytes // (W * itemsize)) // sublane * sublane)
        tr = min(rows_budget, (R // sublane) * sublane)
        min_steps = 8                # keep >=8 steps so v7x megacore can shard
        if R >= min_steps * sublane:
            tr_for_steps = max(sublane, (R // min_steps) // sublane * sublane)
            tr = min(tr, tr_for_steps)

    grid = (pl.cdiv(R, tr),)         # ragged last block is masked by Pallas

    cost = pl.CostEstimate(
        flops=2 * R * W,
        transcendentals=0,
        bytes_accessed=(2 * R * W + 2 * W) * itemsize,
    )

    out = pl.pallas_call(
        _normalization_kernel,
        out_shape=jax.ShapeDtypeStruct((R, W), x.dtype),
        grid_spec=pl.GridSpec(
            grid=grid,
            in_specs=[
                pl.BlockSpec((tr, W), lambda i: (i, 0)),   # x tile (pipelined)
                pl.BlockSpec((1, W), lambda i: (0, 0)),    # mean   (resident)
                pl.BlockSpec((1, W), lambda i: (0, 0)),    # 1/std  (resident)
            ],
            out_specs=pl.BlockSpec((tr, W), lambda i: (i, 0)),
        ),
        compiler_params=pltpu.CompilerParams(
            dimension_semantics=("parallel",),
        ),
        cost_estimate=cost,
    )(x_work, m_work, s_work)

    if pack > 1:
        out = out.reshape(B, n_in)   # free reshape back
    return out.reshape(orig_shape)


if __name__ == "__main__":
    n_in = 32
    key = jax.random.PRNGKey(0)
    k1, k2, k3 = jax.random.split(key, 3)

    # Deterministic "dataset statistics" (what the ctor would receive as lists).
    mean = jnp.linspace(-1.0, 1.0, n_in, dtype=jnp.float32).reshape(1, n_in)
    std = (0.5 + jnp.arange(n_in, dtype=jnp.float32) / n_in).reshape(1, n_in)

    # Case 1: module-consistent small batch — force the Pallas path to verify it.
    B_small = 8
    x_small = jax.random.normal(k1, (B_small, n_in), dtype=jnp.float32)
    out_small = jax.block_until_ready(
        normalization(x_small, mean, std, force_kernel=True))
    ref_small = (x_small - mean) / std
    assert out_small.shape == x_small.shape and out_small.dtype == x_small.dtype
    assert jnp.allclose(out_small, ref_small, atol=1e-5, rtol=1e-5)

    # Case 2: larger batch exercising lane-packing + multi-step pipelined grid.
    B_big = 2048
    x_big = jax.random.normal(k2, (B_big, n_in), dtype=jnp.float32)
    out_big = jax.block_until_ready(normalization(x_big, mean, std))
    ref_big = (x_big - mean) / std
    assert out_big.shape == x_big.shape and out_big.dtype == x_big.dtype
    assert jnp.allclose(out_big, ref_big, atol=1e-5, rtol=1e-5)

    # Case 3: n_in not a divisor of 128 + ragged last row-block (no padding path).
    n_in3 = 48
    mean3 = jnp.linspace(-0.5, 0.5, n_in3, dtype=jnp.float32).reshape(1, n_in3)
    std3 = (0.75 + jnp.arange(n_in3, dtype=jnp.float32) / n_in3).reshape(1, n_in3)
    B3 = 200                                  # pack=8 -> R=25, tr=24, ragged tail
    x3 = jax.random.normal(k3, (B3, n_in3), dtype=jnp.float32)
    out3 = jax.block_until_ready(
        normalization(x3, mean3, std3, force_kernel=True))
    ref3 = (x3 - mean3) / std3
    assert out3.shape == x3.shape and out3.dtype == x3.dtype
    assert jnp.allclose(out3, ref3, atol=1e-5, rtol=1e-5)

    print("KERNEL_OK")
</pallas_src>

<mosaic_0001>
module attributes {stable_mosaic.version = 11 : i64} {
  func.func @_normalization_kernel(%arg0: i32, %arg1: memref<2x128xf32, #tpu.memory_space<vmem>>, %arg2: memref<1x128xf32, #tpu.memory_space<vmem>>, %arg3: memref<1x128xf32, #tpu.memory_space<vmem>>, %arg4: memref<2x128xf32, #tpu.memory_space<vmem>>) attributes {dimension_semantics = [#tpu.dimension_semantics<parallel>], iteration_bounds = array<i64: 1>, scalar_prefetch = 0 : i64, scratch_operands = 0 : i64, tpu.core_type = #tpu.core_type<tc>, window_params = [{transform_indices = @transform_0, window_bounds = array<i64: 2, 128>}, {pipeline_mode = #tpu.pipeline_mode<synchronous>, transform_indices = @transform_1, window_bounds = array<i64: 1, 128>}, {pipeline_mode = #tpu.pipeline_mode<synchronous>, transform_indices = @transform_2, window_bounds = array<i64: 1, 128>}, {transform_indices = @transform_3, window_bounds = array<i64: 2, 128>}]} {
    %c0 = arith.constant 0 : index
    %c0_0 = arith.constant 0 : index
    %0 = vector.load %arg1[%c0, %c0_0] : memref<2x128xf32, #tpu.memory_space<vmem>>, vector<2x128xf32>
    %c0_1 = arith.constant 0 : index
    %c0_2 = arith.constant 0 : index
    %1 = vector.load %arg2[%c0_1, %c0_2] : memref<1x128xf32, #tpu.memory_space<vmem>>, vector<1x128xf32>
    %2 = vector.broadcast %1 : vector<1x128xf32> to vector<2x128xf32>
    %3 = arith.subf %0, %2 : vector<2x128xf32>
    %c0_3 = arith.constant 0 : index
    %c0_4 = arith.constant 0 : index
    %4 = vector.load %arg3[%c0_3, %c0_4] : memref<1x128xf32, #tpu.memory_space<vmem>>, vector<1x128xf32>
    %5 = vector.broadcast %4 : vector<1x128xf32> to vector<2x128xf32>
    %6 = arith.mulf %3, %5 : vector<2x128xf32>
    %c0_5 = arith.constant 0 : index
    %c0_6 = arith.constant 0 : index
    %7 = vector.load %arg4[%c0_5, %c0_6] : memref<2x128xf32, #tpu.memory_space<vmem>>, vector<2x128xf32>
    tpu.vector_store %arg4[%c0_5, %c0_6], %6 {strides = array<i32>} : memref<2x128xf32, #tpu.memory_space<vmem>>, vector<2x128xf32>,
    return
  }
  func.func @transform_0(%arg0: i32) -> (i32, i32) {
    %c0_i32 = arith.constant 0 : i32
    %c0_i32_0 = arith.constant 0 : i32
    return %arg0, %c0_i32 : i32, i32
  }
  func.func @transform_1(%arg0: i32) -> (i32, i32) {
    %c0_i32 = arith.constant 0 : i32
    %c0_i32_0 = arith.constant 0 : i32
    %c0_i32_1 = arith.constant 0 : i32
    return %c0_i32, %c0_i32_0 : i32, i32
  }
  func.func @transform_2(%arg0: i32) -> (i32, i32) {
    %c0_i32 = arith.constant 0 : i32
    %c0_i32_0 = arith.constant 0 : i32
    %c0_i32_1 = arith.constant 0 : i32
    return %c0_i32, %c0_i32_0 : i32, i32
  }
  func.func @transform_3(%arg0: i32) -> (i32, i32) {
    %c0_i32 = arith.constant 0 : i32
    %c0_i32_0 = arith.constant 0 : i32
    return %arg0, %c0_i32 : i32, i32
  }
}

</mosaic_0001>

<bundles_post_ra>
// kernel: tpu_custom_call.1
= control target key start
LH: loop header
LB: loop body
LE: loop exit
PB: predicated region body
PF: predicated region fallthrough
CT: control target
= control target key end

     0   :  { %8 = vsyncpa [#allocation3], 0  ;;  %s164_s0 = inlined_call_operand.hbm [shape: f32[2,128], index: 0, kind: input, shape index: {}]   ;;  %s165_s1 = inlined_call_operand.vmem [shape: f32[1,128], index: 1, kind: input, shape index: {}]   ;;  %s166_s2 = inlined_call_operand.vmem [shape: f32[1,128], index: 2, kind: input, shape index: {}]   ;;  %s167_s3 = inlined_call_operand.hbm [shape: f32[2,128], index: 3, kind: output, shape index: {}]  }
   0x1   :  { %9 = vsyncpa [#allocation4], 0  ;;  %s112_s12 = smov [#allocation2]   ;;  %s64_s16 = scalar_lea.hbm %s164_s0, 32 }
   0x2   :  { %s16_s13 = sshll.u32 %s112_s12, 4  ;;  %p65_p0 = scmp.ne.s32.totalorder %s164_s0, %s64_s16  ;;  %s17_s13 = int_to_ptr.vmem [resolvable:$true] %s16_s13 }
   0x3   :  { %p68_p1 = scmp.lt.u32.totalorder %s64_s16, %s164_s0 }
   0x5   :  { %p70_p2 = pnand %p68_p1, %p65_p0 }
   0x7   :  { %73 = shalt.err (!%p70_p2)
}
   0x8   :  { %s74_s21 = scalar_lea.vmem %s17_s13, 32  ;;  %p79_p4 = scmp.lt.s32.totalorder %s17_s13, %s17_s13 }
   0x9   :  { %p75_p3 = scmp.ne.s32.totalorder %s17_s13, %s74_s21  ;;  %p80_p5 = scmp.lt.s32.totalorder %s74_s21, %s74_s21 }
   0xb   :  { %p81_p6 = por %p80_p5, %p79_p4 }
   0xd   :  { %p82_p7 = pnand %p81_p6, %p75_p3 }
   0xf   :  { %85 = shalt.err (!%p82_p7)
}
  0x10   :  { %19 = dma.hbm_to_vmem [thread:$0]  %s164_s0, 32, %s17_s13, [#allocation3]  }
  0x11   :  { %108 = dma.done.wait [#allocation3], 32  }
  0x12   :  { %109 = vsyncadd [#allocation3], 4294967264  ;;  %s113_s24 = smov [#allocation5]   ;;  %v27_v0 = vld [vmem:[#allocation2] sm:$0x3] }
  0x13   :  { %s51_s25 = sshll.u32 %s113_s24, 4  ;;  %v60_v1 = vld [vmem:[%s165_s1] ss:$0 sm:$0xff]  ;;  %s52_s25 = int_to_ptr.vmem [resolvable:$true] %s51_s25 }
  0x14   :  { %v61_v2 = vld [vmem:[%s166_s2] ss:$0 sm:$0xff]  ;;  %v35_v3 = vsub.f32 %v27_v0, %v60_v1  ;;  %s86_s30 = scalar_lea.vmem %s52_s25, 32  ;;  %p91_p9 = scmp.lt.s32.totalorder %s52_s25, %s52_s25 }
  0x15   :  { %p87_p8 = scmp.ne.s32.totalorder %s52_s25, %s86_s30  ;;  %p92_p10 = scmp.lt.s32.totalorder %s86_s30, %s86_s30 }
  0x16   :  { %v43_v4 = vmul.f32 %v61_v2, %v35_v3 }
  0x17   :  { %p93_p11 = por %p92_p10, %p91_p9 }
  0x18   :  { %44 = vst [vmem:[#allocation5] sm:$0x3] %v43_v4 }
  0x19   :  { %p94_p12 = pnand %p93_p11, %p87_p8 }
  0x1b   :  { %97 = shalt.err (!%p94_p12)
}
  0x1c   :  { %s98_s5 = scalar_lea.hbm %s167_s3, 32 }
  0x1d   :  { %p99_p13 = scmp.ne.s32.totalorder %s167_s3, %s98_s5  ;;  %p102_p0 = scmp.lt.u32.totalorder %s98_s5, %s167_s3 }
  0x1f   :  { %p104_p1 = pnand %p102_p0, %p99_p13 }
  0x21   :  { %107 = shalt.err (!%p104_p1)
}
  0x22   :  { %54 = dma.vmem_to_hbm [thread:$0]  %s52_s25, 32, %s167_s3, [#allocation4]  }
  0x23   :  { %110 = dma.done.wait [#allocation4], 32  }
  0x24   :  { %111 = vsyncadd [#allocation4], 4294967264 }
  0x25   :  { %58 = vsyncpa [#allocation3], 1 }
  0x26   :  { %59 = vsyncpa [#allocation4], 1 }

</bundles_post_ra>
